<compile_context>
chip_gen: v7x
topology: tpu7x:2x2x1
jax: 0.10.0
libtpu: 0.0.40
codegen_flags: <defaults>
</compile_context>

<pallas_src>
import jax
import jax.numpy as jnp
from jax.experimental import pallas as pl
from jax.experimental.pallas import tpu as pltpu


def _calibrated_camera_kernel(params_ref, pts_ref, out_ref):
    """Projects one (3, S, 128) channel-first tile of points for one batch.

    params_ref : (B, 12) float32 in SMEM.  Fully folded P = K @ [R | t]:
        [0:3]   P[0, :] = fx * R[0, :] + cx * R[2, :]
        [3:6]   P[1, :] = fy * R[1, :] + cy * R[2, :]
        [6:9]   P[2, :] =      R[2, :]
        [9:12]  (fx*t0 + cx*t2,  fy*t1 + cy*t2,  t2)
    pts_ref : (3, S, 128) x/y/z coordinate planes (lane- and sublane-dense).
    out_ref : (2, S, 128) u/v pixel-coordinate planes.
    """
    b = pl.program_id(0)

    x = pts_ref[0]
    y = pts_ref[1]
    z = pts_ref[2]

    p00 = params_ref[b, 0]
    p01 = params_ref[b, 1]
    p02 = params_ref[b, 2]
    p10 = params_ref[b, 3]
    p11 = params_ref[b, 4]
    p12 = params_ref[b, 5]
    p20 = params_ref[b, 6]
    p21 = params_ref[b, 7]
    p22 = params_ref[b, 8]
    t0 = params_ref[b, 9]
    t1 = params_ref[b, 10]
    t2 = params_ref[b, 11]

    # Camera-frame depth; one exact reciprocal shared by both outputs
    # (Inf/NaN for points on the camera plane, matching torch.div).
    zc = p20 * x + p21 * y + p22 * z + t2
    inv_z = 1.0 / zc

    u = (p00 * x + p01 * y + p02 * z + t0) * inv_z
    v = (p10 * x + p11 * y + p12 * z + t1) * inv_z

    # Two full-tile, unmasked, lane-dense stores.
    out_ref[0] = u.astype(out_ref.dtype)
    out_ref[1] = v.astype(out_ref.dtype)


def _select_tile_rows(ns, batch, cap_rows=2048, min_total_steps=8,
                      min_rows=512):
    """Pick the tile height (rows of 128-lane vregs) for one grid step.

    Priorities:
      1. legality: rows must be a multiple of 8 (f32 sublane tiling) or the
         full plane extent `ns`;
      2. stay under `cap_rows` so the double-buffered footprint
         (2 bufs x 5 planes x rows x 512 B) fits every generation's scoped
         VMEM default (cap_rows=2048 -> 10 MiB < 16 MiB on v5e, << 32 MiB on
         v6e/v7x and << v7x's 64 MiB physical VMEM);
      3. keep >= min_total_steps total grid steps so the pipeline prologue /
         epilogue stays hidden and both v7x TensorCores get work;
      4. but never shrink below `min_rows` rows just to manufacture steps
         (the ~0.35 us per-step overhead would dominate the DMA again).
    """
    cap_rows = max(8, cap_rows - cap_rows % 8)
    if ns % 8 != 0 or ns <= 8:
        # Only the full-plane block is legal for this ns.
        if ns > cap_rows:
            raise ValueError(
                "N per batch must be a multiple of 1024 to tile planes this "
                "large; pad the point cloud or pass tile_rows explicitly.")
        return ns
    divisors = [d for d in range(8, min(cap_rows, ns) + 1, 8) if ns % d == 0]
    if not divisors:
        return ns
    want_tiles = max(1, -(-min_total_steps // max(batch, 1)))  # ceil div
    good = [d for d in divisors if ns // d >= want_tiles]
    if good:
        s = max(good)
        if s < min_rows:
            bigger = [d for d in divisors if d >= min_rows]
            s = min(bigger) if bigger else max(divisors)
        return s
    return max(divisors)


def calibrated_camera_project_cf(points_cf, rotation, translation,
                                 focal_x, focal_y, center, *,
                                 tile_rows=None, cap_rows=2048):
    """Fast path.  points_cf: (B, 3, N) channel-first -> (B, 2, N) u/v planes.

    Only zero-copy reshapes happen here; all per-point work is in the kernel.
    (Assumes a 32-bit point dtype; bf16 would need 16-row tiling granularity.)
    """
    B, C, N = points_cf.shape
    assert C == 3, "points_cf must be channel-first (B, 3, N)"
    assert N % 128 == 0, "N must be a multiple of 128 (pad points if needed)"
    ns = N // 128

    if tile_rows is None:
        s = _select_tile_rows(ns, B, cap_rows)
    else:
        s = int(tile_rows)
        assert s == ns or (ns % s == 0 and s % 8 == 0), (
            "tile_rows must divide N/128 and be a multiple of 8 (or equal it)")
    num_tiles = ns // s

    pts = points_cf.reshape(B, 3, ns, 128)       # contiguous -> free reshape

    # Fold the full intrinsics K = [[fx,0,cx],[0,fy,cy],[0,0,1]] into [R | t];
    # pack all per-batch calibration scalars into one tiny SMEM table.
    f32 = jnp.float32
    r = rotation.astype(f32)
    t = translation.astype(f32)
    fx = focal_x.astype(f32)[:, None]
    fy = focal_y.astype(f32)[:, None]
    cx = center.astype(f32)[:, 0:1]
    cy = center.astype(f32)[:, 1:2]
    params = jnp.concatenate(
        [r[:, 0, :] * fx + r[:, 2, :] * cx,
         r[:, 1, :] * fy + r[:, 2, :] * cy,
         r[:, 2, :],
         t[:, 0:1] * fx + t[:, 2:3] * cx,
         t[:, 1:2] * fy + t[:, 2:3] * cy,
         t[:, 2:3]], axis=1)                                      # (B, 12)

    in_spec = pl.BlockSpec((None, 3, s, 128), lambda b, n: (b, 0, n, 0))
    out_spec = pl.BlockSpec((None, 2, s, 128), lambda b, n: (b, 0, n, 0))

    itemsize = jnp.dtype(points_cf.dtype).itemsize
    cost = pl.CostEstimate(
        flops=26 * B * N,
        transcendentals=B * N,                      # the reciprocal
        bytes_accessed=(3 + 2) * B * N * itemsize + params.size * 4)

    out = pl.pallas_call(
        _calibrated_camera_kernel,
        out_shape=jax.ShapeDtypeStruct((B, 2, ns, 128), points_cf.dtype),
        grid=(B, num_tiles),
        in_specs=[
            pl.BlockSpec(memory_space=pltpu.MemorySpace.SMEM),   # params table
            in_spec,                                             # xyz planes
        ],
        out_specs=out_spec,                                      # uv planes
        compiler_params=pltpu.CompilerParams(
            dimension_semantics=("parallel", "parallel")),
        cost_estimate=cost,
    )(params, pts)

    return out.reshape(B, 2, N)


def calibrated_camera_forward(points, rotation, translation, focal_x, focal_y,
                              center, *, tile_rows=None):
    """Drop-in equivalent of CalibratedCamera.forward: (B, N, 3) -> (B, N, 2).

    The two transposes below are layout glue outside the kernel (one extra
    HBM read+write pass each way in XLA).  Callers that can produce
    channel-first (B, 3, N) points where they are generated should call
    calibrated_camera_project_cf directly and pay zero extra HBM traffic.
    """
    points_cf = jnp.transpose(points, (0, 2, 1))
    uv = calibrated_camera_project_cf(points_cf, rotation, translation,
                                      focal_x, focal_y, center,
                                      tile_rows=tile_rows)
    return jnp.transpose(uv, (0, 2, 1))


if __name__ == "__main__":
    B, N = 2, 4096
    dtype = jnp.float32

    # deterministic inputs
    kp, _ = jax.random.split(jax.random.PRNGKey(0))
    points = jax.random.normal(kp, (B, N, 3), dtype) * 0.5 + jnp.array(
        [0.0, 0.0, 3.0], dtype)

    # deterministic "calibration" parameters (stand-in for the XML file):
    # rotation about z by 0.1 rad repeated over batch (as in __init__),
    # translation repeated over batch, per-batch focal lengths and center.
    # TODO(synk): XML parsing (extract_cam_param_xml) is host-side I/O, not a kernel.
    theta = 0.1
    c, s = jnp.cos(theta), jnp.sin(theta)
    rot_single = jnp.array([[c, -s, 0.0], [s, c, 0.0], [0.0, 0.0, 1.0]], dtype)
    rotation = jnp.tile(rot_single[None], (B, 1, 1))                        # (B, 3, 3)
    translation = jnp.tile(jnp.array([[0.05, -0.02, 0.5]], dtype), (B, 1))  # (B, 3)
    focal_x = jnp.full((B,), 500.0, dtype)
    focal_y = jnp.full((B,), 505.0, dtype)
    center = jnp.tile(jnp.array([[320.0, 240.0]], dtype), (B, 1))           # (B, 2)

    # tile_rows=8 -> 1024 points / tile -> grid (B, 4) = 8 steps: exercises
    # multi-step pipelining and gives plenty of tiles for the v7x megacore
    # split.  (Production sizes use the automatic up-to-2048-row tiles.)
    out = calibrated_camera_forward(points, rotation, translation,
                                    focal_x, focal_y, center, tile_rows=8)
    out = jax.block_until_ready(out)

    # pure-JAX reference mirroring the PyTorch forward exactly
    ones = jnp.ones(points.shape[:-1] + (1,), dtype)
    bottom = jnp.tile(jnp.array([[[0.0, 0.0, 0.0, 1.0]]], dtype), (B, 1, 1))
    T = jnp.concatenate(
        [jnp.concatenate([rotation, translation[:, :, None]], axis=2), bottom],
        axis=1)                                                      # (B, 4, 4)
    pts_h = jnp.concatenate([points, ones], axis=-1)                 # (B, N, 4)
    proj = jnp.einsum('bki,bji->bjk', T, pts_h)
    img = proj[:, :, :2] / proj[:, :, 2:3]
    cam_mat = (jnp.zeros((B, 2, 2), dtype)
               .at[:, 0, 0].set(focal_x)
               .at[:, 1, 1].set(focal_y))
    ref = jnp.einsum('bki,bji->bjk', cam_mat, img) + center[:, None, :]

    assert out.shape == ref.shape == (B, N, 2)
    assert jnp.allclose(out, ref, atol=1e-2, rtol=1e-4), float(
        jnp.max(jnp.abs(out - ref)))
    print("KERNEL_OK")
</pallas_src>

<mosaic_0001>
module attributes {stable_mosaic.version = 11 : i64} {
  func.func @_calibrated_camera_kernel(%arg0: i32, %arg1: i32, %arg2: memref<2x12xf32, #tpu.memory_space<smem>>, %arg3: memref<1x3x8x128xf32, #tpu.memory_space<vmem>>, %arg4: memref<1x2x8x128xf32, #tpu.memory_space<vmem>>) attributes {dimension_semantics = [#tpu.dimension_semantics<parallel>, #tpu.dimension_semantics<parallel>], iteration_bounds = array<i64: 2, 4>, scalar_prefetch = 0 : i64, scratch_operands = 0 : i64, tpu.core_type = #tpu.core_type<tc>, window_params = [{transform_indices = @transform_0, window_bounds = array<i64: 2, 12>}, {transform_indices = @transform_1, window_bounds = array<i64: 1, 3, 8, 128>}, {transform_indices = @transform_2, window_bounds = array<i64: 1, 2, 8, 128>}]} {
    %c0 = arith.constant 0 : index
    %c0_0 = arith.constant 0 : index
    %c0_1 = arith.constant 0 : index
    %c0_2 = arith.constant 0 : index
    %0 = vector.load %arg3[%c0, %c0_0, %c0_1, %c0_2] : memref<1x3x8x128xf32, #tpu.memory_space<vmem>>, vector<1x1x8x128xf32>
    %1 = vector.shape_cast %0 : vector<1x1x8x128xf32> to vector<8x128xf32>
    %c0_3 = arith.constant 0 : index
    %c1 = arith.constant 1 : index
    %c0_4 = arith.constant 0 : index
    %c0_5 = arith.constant 0 : index
    %2 = vector.load %arg3[%c0_3, %c1, %c0_4, %c0_5] : memref<1x3x8x128xf32, #tpu.memory_space<vmem>>, vector<1x1x8x128xf32>
    %3 = vector.shape_cast %2 : vector<1x1x8x128xf32> to vector<8x128xf32>
    %c0_6 = arith.constant 0 : index
    %c2 = arith.constant 2 : index
    %c0_7 = arith.constant 0 : index
    %c0_8 = arith.constant 0 : index
    %4 = vector.load %arg3[%c0_6, %c2, %c0_7, %c0_8] : memref<1x3x8x128xf32, #tpu.memory_space<vmem>>, vector<1x1x8x128xf32>
    %5 = vector.shape_cast %4 : vector<1x1x8x128xf32> to vector<8x128xf32>
    %6 = arith.index_cast %arg0 : i32 to index
    %c0_9 = arith.constant 0 : index
    %7 = memref.load %arg2[%6, %c0_9] : memref<2x12xf32, #tpu.memory_space<smem>>
    %8 = arith.index_cast %arg0 : i32 to index
    %c1_10 = arith.constant 1 : index
    %9 = memref.load %arg2[%8, %c1_10] : memref<2x12xf32, #tpu.memory_space<smem>>
    %10 = arith.index_cast %arg0 : i32 to index
    %c2_11 = arith.constant 2 : index
    %11 = memref.load %arg2[%10, %c2_11] : memref<2x12xf32, #tpu.memory_space<smem>>
    %12 = arith.index_cast %arg0 : i32 to index
    %c3 = arith.constant 3 : index
    %13 = memref.load %arg2[%12, %c3] : memref<2x12xf32, #tpu.memory_space<smem>>
    %14 = arith.index_cast %arg0 : i32 to index
    %c4 = arith.constant 4 : index
    %15 = memref.load %arg2[%14, %c4] : memref<2x12xf32, #tpu.memory_space<smem>>
    %16 = arith.index_cast %arg0 : i32 to index
    %c5 = arith.constant 5 : index
    %17 = memref.load %arg2[%16, %c5] : memref<2x12xf32, #tpu.memory_space<smem>>
    %18 = arith.index_cast %arg0 : i32 to index
    %c6 = arith.constant 6 : index
    %19 = memref.load %arg2[%18, %c6] : memref<2x12xf32, #tpu.memory_space<smem>>
    %20 = arith.index_cast %arg0 : i32 to index
    %c7 = arith.constant 7 : index
    %21 = memref.load %arg2[%20, %c7] : memref<2x12xf32, #tpu.memory_space<smem>>
    %22 = arith.index_cast %arg0 : i32 to index
    %c8 = arith.constant 8 : index
    %23 = memref.load %arg2[%22, %c8] : memref<2x12xf32, #tpu.memory_space<smem>>
    %24 = arith.index_cast %arg0 : i32 to index
    %c9 = arith.constant 9 : index
    %25 = memref.load %arg2[%24, %c9] : memref<2x12xf32, #tpu.memory_space<smem>>
    %26 = arith.index_cast %arg0 : i32 to index
    %c10 = arith.constant 10 : index
    %27 = memref.load %arg2[%26, %c10] : memref<2x12xf32, #tpu.memory_space<smem>>
    %28 = arith.index_cast %arg0 : i32 to index
    %c11 = arith.constant 11 : index
    %29 = memref.load %arg2[%28, %c11] : memref<2x12xf32, #tpu.memory_space<smem>>
    %30 = vector.broadcast %19 : f32 to vector<8x128xf32>
    %31 = arith.mulf %30, %1 : vector<8x128xf32>
    %32 = vector.broadcast %21 : f32 to vector<8x128xf32>
    %33 = arith.mulf %32, %3 : vector<8x128xf32>
    %34 = arith.addf %31, %33 : vector<8x128xf32>
    %35 = vector.broadcast %23 : f32 to vector<8x128xf32>
    %36 = arith.mulf %35, %5 : vector<8x128xf32>
    %37 = arith.addf %34, %36 : vector<8x128xf32>
    %38 = vector.broadcast %29 : f32 to vector<8x128xf32>
    %39 = arith.addf %37, %38 : vector<8x128xf32>
    %cst = arith.constant 1.000000e+00 : f32
    %40 = vector.broadcast %cst : f32 to vector<8x128xf32>
    %41 = arith.divf %40, %39 : vector<8x128xf32>
    %42 = vector.broadcast %7 : f32 to vector<8x128xf32>
    %43 = arith.mulf %42, %1 : vector<8x128xf32>
    %44 = vector.broadcast %9 : f32 to vector<8x128xf32>
    %45 = arith.mulf %44, %3 : vector<8x128xf32>
    %46 = arith.addf %43, %45 : vector<8x128xf32>
    %47 = vector.broadcast %11 : f32 to vector<8x128xf32>
    %48 = arith.mulf %47, %5 : vector<8x128xf32>
    %49 = arith.addf %46, %48 : vector<8x128xf32>
    %50 = vector.broadcast %25 : f32 to vector<8x128xf32>
    %51 = arith.addf %49, %50 : vector<8x128xf32>
    %52 = arith.mulf %51, %41 : vector<8x128xf32>
    %53 = vector.broadcast %13 : f32 to vector<8x128xf32>
    %54 = arith.mulf %53, %1 : vector<8x128xf32>
    %55 = vector.broadcast %15 : f32 to vector<8x128xf32>
    %56 = arith.mulf %55, %3 : vector<8x128xf32>
    %57 = arith.addf %54, %56 : vector<8x128xf32>
    %58 = vector.broadcast %17 : f32 to vector<8x128xf32>
    %59 = arith.mulf %58, %5 : vector<8x128xf32>
    %60 = arith.addf %57, %59 : vector<8x128xf32>
    %61 = vector.broadcast %27 : f32 to vector<8x128xf32>
    %62 = arith.addf %60, %61 : vector<8x128xf32>
    %63 = arith.mulf %62, %41 : vector<8x128xf32>
    %c0_12 = arith.constant 0 : index
    %c0_13 = arith.constant 0 : index
    %c0_14 = arith.constant 0 : index
    %c0_15 = arith.constant 0 : index
    %64 = vector.load %arg4[%c0_12, %c0_13, %c0_14, %c0_15] : memref<1x2x8x128xf32, #tpu.memory_space<vmem>>, vector<1x1x8x128xf32>
    %65 = vector.shape_cast %64 : vector<1x1x8x128xf32> to vector<8x128xf32>
    %66 = vector.shape_cast %52 : vector<8x128xf32> to vector<1x1x8x128xf32>
    tpu.vector_store %arg4[%c0_12, %c0_13, %c0_14, %c0_15], %66 {strides = array<i32>} : memref<1x2x8x128xf32, #tpu.memory_space<vmem>>, vector<1x1x8x128xf32>,
    %c0_16 = arith.constant 0 : index
    %c1_17 = arith.constant 1 : index
    %c0_18 = arith.constant 0 : index
    %c0_19 = arith.constant 0 : index
    %67 = vector.load %arg4[%c0_16, %c1_17, %c0_18, %c0_19] : memref<1x2x8x128xf32, #tpu.memory_space<vmem>>, vector<1x1x8x128xf32>
    %68 = vector.shape_cast %67 : vector<1x1x8x128xf32> to vector<8x128xf32>
    %69 = vector.shape_cast %63 : vector<8x128xf32> to vector<1x1x8x128xf32>
    tpu.vector_store %arg4[%c0_16, %c1_17, %c0_18, %c0_19], %69 {strides = array<i32>} : memref<1x2x8x128xf32, #tpu.memory_space<vmem>>, vector<1x1x8x128xf32>,
    return
  }
  func.func @transform_0(%arg0: i32, %arg1: i32) -> (i32, i32) {
    %c0_i32 = arith.constant 0 : i32
    %c0_i32_0 = arith.constant 0 : i32
    %c0_i32_1 = arith.constant 0 : i32
    return %c0_i32, %c0_i32_0 : i32, i32
  }
  func.func @transform_1(%arg0: i32, %arg1: i32) -> (i32, i32, i32, i32) {
    %c0_i32 = arith.constant 0 : i32
    %c0_i32_0 = arith.constant 0 : i32
    %c0_i32_1 = arith.constant 0 : i32
    return %arg0, %c0_i32, %arg1, %c0_i32_0 : i32, i32, i32, i32
  }
  func.func @transform_2(%arg0: i32, %arg1: i32) -> (i32, i32, i32, i32) {
    %c0_i32 = arith.constant 0 : i32
    %c0_i32_0 = arith.constant 0 : i32
    %c0_i32_1 = arith.constant 0 : i32
    return %arg0, %c0_i32, %arg1, %c0_i32_0 : i32, i32, i32, i32
  }
}

</mosaic_0001>

<bundles_post_ra>
// kernel: tpu_custom_call.1
= control target key start
LH: loop header
LB: loop body
LE: loop exit
PB: predicated region body
PF: predicated region fallthrough
CT: control target
= control target key end

     0   :  { %s909_s0 = inlined_call_operand.hbm [shape: f32[2,12], index: 0, kind: input, shape index: {}]   ;;  %s910_s1 = inlined_call_operand.hbm [shape: f32[2,3,32,128], index: 1, kind: input, shape index: {}]   ;;  %s911_s2 = inlined_call_operand.hbm [shape: f32[2,2,32,128], index: 2, kind: output, shape index: {}]  }
   0x1   :  { %918 = sst [smem:[#allocation13_spill]] %s909_s0 }
   0x2   :  { %919 = sst [smem:[#allocation14_spill]] %s910_s1 }
   0x3   :  { %7 = vsyncpa [#allocation5], 0 }
   0x4   :  { %8 = vsyncpa [#allocation3], 0 }
   0x5   :  { %10 = vsyncpa [#allocation3 + $0x1], 0 }
   0x6   :  { %11 = vsyncpa [#allocation4], 0 }
   0x7   :  { %13 = vsyncpa [#allocation4 + $0x1], 0  ;;  %s661_s9 = smov 0   ;;  %s663_s10 = smov 0  }
   0x8   :  { %s665_s11 = smov 0   ;;  %s667_s12 = smov 0  }
   0x9   :  { %s669_s13 = smov 0   ;;  %s671_s14 = smov 0  }
   0xa   :  { %s673_s15 = smov 0   ;;  %s675_s16 = smov 0  }
   0xb LB: > { %s372_s17 = sadd.s32 4294967295, %s635_s16   ;;  %s373_s18 = sadd.s32 4294967294, %s635_s16   ;;  %s635_s16 = sphi %s675_s16, %s19_s16   ;;  %s631_s15 = sphi %s673_s15, %s944_s15   ;;  %s627_s14 = sphi %s671_s14, %s943_s14   ;;  %s623_s13 = sphi %s669_s13, %s942_s13   ;;  %s619_s12 = sphi %s667_s12, %s941_s12   ;;  %s615_s11 = sphi %s665_s11, %s940_s11   ;;  %s611_s10 = sphi %s663_s10, %s939_s10   ;;  %s607_s9 = sphi %s661_s9, %s938_s9  }
   0xc   : > { %p68_p0 = scmp.ne.s32.totalorder %s615_s11, %s611_s10  ;;  %p69_p1 = scmp.eq.s32.totalorder %s635_s16, 0 }
   0xd   : > { %p74_p2 = scmp.ne.s32.totalorder %s611_s10, %s607_s9  ;;  %p709_p3 = scmp.eq.s32.totalorder %s372_s17, 0 }
   0xe   : > { %p100_p4 = scmp.eq.s32.totalorder %s372_s17, 7  ;;  %p70_p5 = por %p69_p1, %p68_p0 }
   0xf   : > { %s920_s20 = scalar_select %p709_p3, 1, 0 }
  0x10   : > { %p106_p6 = scmp.eq.s32.totalorder %s373_s18, 7  ;;  %p715_p7 = por %p709_p3, %p74_p2 }
  0x11   : > { %p719_p8 = por %p100_p4, %p68_p0  ;;  %p374_p10 = scmp.ge.s32.totalorder %s635_s16, 1 }
  0x12   : > { %s921_s21 = scalar_select %p715_p7, 1, 0 }
  0x13   : > { %s922_s22 = scalar_select %p719_p8, 1, 0 }
  0x14   : > { %p723_p9 = por %p106_p6, %p74_p2  ;;  %p113_p11 = scmp.lt.s32.totalorder %s635_s16, 9 }
  0x15   : > { %p414_p13 = scmp.lt.s32.totalorder %s635_s16, 8  ;;  %p927_p0 = scmp.ne.s32.totalorder %s920_s20, 0 }
  0x16   : > { %s923_s23 = scalar_select %p723_p9, 1, 0 }
  0x17   : > { %p729_p12 = pnand %p374_p10, %p113_p11  ;;  %p736_p3 = pnand %p414_p13, %p70_p5 }
  0x18   : > { %924 = sst [smem:[#allocation11_spill]] %s923_s23  ;;  %s28_s26 = sadd.s32 1, %s627_s14 }
  0x19   : > { %p401_p1 = pneg %p729_p12  ;;  %s31_s27 = sadd.s32 1, %s631_s15 }
  0x1a   : > { %p29_p2 = scmp.ge.s32.totalorder %s28_s26, 4  ;;  %s928_s0 = sld [smem:[#allocation13_spill]] }
  0x1b   : > { %p402_p4 = pnand %p401_p1, %p927_p0 }
  0x1d   : > { %p492_p10 = pneg %p402_p4 }
  0x20   : > { %s490_s30 = scalar_lea.hbm %s928_s0, 32 }
  0x21   : > { %p491_p6 = scmp.ne.s32.totalorder %s928_s0, %s490_s30  ;;  %p497_p5 = scmp.lt.u32.totalorder %s490_s30, %s928_s0 }
  0x23   : > { %p493_p11 = pnand %p492_p10, %p491_p6 }
  0x25   : > { %p494_p9 = pneg %p493_p11 }
  0x27   : > { %p499_p13 = pnand %p497_p5, %p494_p9 }
  0x29   : > { %502 = shalt.err (!%p499_p13)
}
  0x2a   : > { %s637_s7 = smov [#allocation2]   ;;  %s946_s26 = smov (%p29_p2, %s28_s26), 0 }
  0x2b   : > { %404 = dma.hbm_to_smem (!%p402_p4), %s928_s0, 32, %s637_s7, [#allocation5]  }
  0x2c   : > { %929 = sst [smem:[#allocation12_spill]] %s946_s26  ;;  %s948_s27 = smov (!%p29_p2, %s31_s27), %s631_s15 }
  0x2d   : > { %s57_s18 = ssub.s32 %s627_s14, %s946_s26  ;;  %s135_s28 = sand.u32 1, %s615_s11  }
  0x2e   : > { %p33_p9 = scmp.ge.s32.totalorder %s948_s27, 2  ;;  %s390_s29 = smul.u32 24, %s135_s28 }
  0x2f   : > { %s391_s30 = smul.u32 12, %s631_s15  ;;  %s930_s1 = sld [smem:[#allocation14_spill]] }
  0x30   : > { %s950_s27 = smov (%p33_p9, %s948_s27), 0  ;;  %s139_s4 = scalar_lea.vmem [#allocation6], %s390_s29 }
  0x31   : > { %s56_s3 = ssub.s32 %s631_s15, %s950_s27  ;;  %s147_s5 = sshll.u32 %s139_s4, 4  ;;  %s773_s5 = int_to_ptr.vmem [resolvable:$true] %s147_s5 }
  0x32   : > { %s58_s6 = sor.u32 %s57_s18, %s56_s3  ;;  %s144_s7 = sadd.s32 %s627_s14, %s391_s30 }
  0x33   : > { %p59_p1 = scmp.eq.s32.totalorder %s58_s6, 0  ;;  %s377_s8 = sshll.u32 %s144_s7, 7 }
  0x34   : > { %s931_s26 = sadd.s32 1, %s615_s11  ;;  %s780_s29 = scalar_lea.sflag [#allocation3], %s135_s28 }
  0x35   : > { %s771_s0 = scalar_lea.hbm %s930_s1, %s377_s8  ;;  %p505_p4 = pneg %p736_p3 }
  0x36   : > { %s778_s23 = scalar_select %p59_p1, %s615_s11, %s931_s26  }
  0x37   : > { %s503_s18 = scalar_lea.hbm %s771_s0, 384  ;;  %s508_s3 = scalar_lea.hbm %s930_s1, 3072 }
  0x38   : > { %p504_p0 = scmp.ne.s32.totalorder %s771_s0, %s503_s18  ;;  %p509_p10 = scmp.lt.u32.totalorder %s771_s0, %s930_s1 }
  0x39   : > { %p510_p11 = scmp.lt.u32.totalorder %s508_s3, %s503_s18  ;;  %p512_p13 = scmp.lt.u32.totalorder %s503_s18, %s771_s0 }
  0x3a   : > { %p506_p2 = pnand %p505_p4, %p504_p0 }
  0x3b   : > { %p511_p5 = por %p510_p11, %p509_p10 }
  0x3c   : > { %p507_p6 = pneg %p506_p2 }
  0x3d   : > { %p513_p9 = por %p512_p13, %p511_p5 }
  0x3f   : > { %p514_p1 = pnand %p513_p9, %p507_p6 }
  0x41   : > { %517 = shalt.err (!%p514_p1)
}
  0x42   : > { %s518_s26 = scalar_lea.vmem %s773_s5, 384  ;;  %s638_s28 = smov [#allocation6]  }
  0x43   : > { %p519_p0 = scmp.ne.s32.totalorder %s773_s5, %s518_s26  ;;  %s523_s7 = sshll.u32 %s638_s28, 4  ;;  %s524_s7 = int_to_ptr.vmem [resolvable:$false] %s523_s7 }
  0x44   : > { %s525_s8 = scalar_lea.vmem %s524_s7, 768  ;;  %p526_p7 = scmp.lt.s32.totalorder %s773_s5, %s524_s7 }
  0x45   : > { %p521_p2 = pnand %p519_p0, %p505_p4  ;;  %p527_p10 = scmp.lt.s32.totalorder %s525_s8, %s518_s26 }
  0x47   : > { %p522_p8 = pneg %p521_p2  ;;  %p528_p11 = por %p527_p10, %p526_p7 }
  0x49   : > { %p529_p5 = pnand %p528_p11, %p522_p8 }
  0x4b   : > { %532 = shalt.err (!%p529_p5)
}
  0x4c   : > { %s639_s17 = smov 512   ;;  %s640_s18 = smov 128  }
  0x4d   : > { %s641_s19 = smov 8   ;;  %159 = sbr.rel (%p729_p12) target bundleno = 141 (0x8d), region = 28 }
  0x4e   : > { %408 = dma.hbm_to_vmem [thread:$0]  (!%p736_p3), %s771_s0, 384, %s773_s5, %s780_s29, %s639_s17, %s640_s18, %s641_s19  }
  0x4f   : > { %p932_p4 = scmp.ne.s32.totalorder (!%p729_p12), %s920_s20, 0 }
  0x54   : > { %594 = dma.done.wait (%p932_p4), [#allocation5], 32  }
  0x55   : > { %596 = vsyncadd (%p932_p4), [#allocation5], 4294967264  ;;  %s815_s30 = sand.u32 1, %s611_s10   ;;  %p933_p7 = scmp.ne.s32.totalorder %s921_s21, 0 }
  0x56   : > { %s392_s3 = smul.u32 24, %s815_s30  ;;  %s166_s4 = scalar_lea.sflag [#allocation3], %s815_s30 }
  0x58   : > { %s169_s6 = scalar_lea.vmem [#allocation6], %s392_s3 }
  0x59   : > { %598 = dma.done.wait (%p933_p7), %s166_s4, 384  }
  0x5a   : > { %600 = vsyncadd (%p933_p7), %s166_s4, 4294966912 }
  0x5b   : > { %174 = sfence }
  0x5c   : > { %s824_s0 = sshll.u32 %s623_s13, 7  ;;  %v191_v0 = vld [vmem:[%s169_s6] sm:$0xff]  ;;  %v381_v1 = vld [vmem:[%s169_s6 + $0x8] sm:$0xff]  ;;  %v382_v2 = vld [vmem:[%s169_s6 + $0x10] sm:$0xff]  ;;  %p934_p8 = scmp.ne.s32.totalorder %s922_s22, 0 }
  0x5d   : > { %s827_s20 = sld [smem:[#allocation2 + %s824_s0]]  ;;  %s198_s24 = sadd.s32 1, %s824_s0 }
  0x5e   : > { %s830_s25 = sld [smem:[#allocation2 + %s198_s24]]  ;;  %s200_s21 = sadd.s32 2, %s824_s0 }
  0x5f   : > { %s208_s5 = sadd.s32 6, %s824_s0  ;;  %s210_s29 = sadd.s32 7, %s824_s0 }
  0x60   : > { %s209_s26 = sld [smem:[#allocation2 + %s208_s5]]  ;;  %s212_s7 = sadd.s32 8, %s824_s0 }
  0x61   : > { %s211_s28 = sld [smem:[#allocation2 + %s210_s29]]  ;;  %s218_s18 = sadd.s32 11, %s824_s0 }
  0x62   : > { %s213_s8 = sld [smem:[#allocation2 + %s212_s7]]  ;;  %s202_s3 = sadd.s32 3, %s824_s0 }
  0x63   : > { %s836_s17 = sld [smem:[#allocation2 + %s200_s21]]  ;;  %s204_s4 = sadd.s32 4, %s824_s0  ;;  %v232_v7 = vstv %s827_s20 }
  0x64   : > { %s219_s19 = sld [smem:[#allocation2 + %s218_s18]]  ;;  %s214_s29 = sadd.s32 9, %s824_s0  ;;  %v234_v8 = vstv %s830_s25  ;;  %v233_v13 = vmul.f32 %v232_v7, %v191_v0 }
  0x65   : > { %s203_s24 = sld [smem:[#allocation2 + %s202_s3]]  ;;  %s206_s21 = sadd.s32 5, %s824_s0  ;;  %v235_v14 = vmul.f32 %v381_v1, %v234_v8 }
  0x66   : > { %v220_v3 = vstv %s209_s26  ;;  %s205_s5 = sld [smem:[#allocation2 + %s204_s4]]  ;;  %s216_s1 = sadd.s32 10, %s824_s0 }
  0x67   : > { %v222_v4 = vstv %s211_s28  ;;  %v221_v5 = vmul.f32 %v220_v3, %v191_v0  ;;  %s207_s7 = sld [smem:[#allocation2 + %s206_s21]]  ;;  %v236_v22 = vadd.f32 %v235_v14, %v233_v13  ;;  %s380_s0 = sshll.u32 %s815_s30, 4 }
  0x68   : > { %v223_v6 = vmul.f32 %v381_v1, %v222_v4  ;;  %v225_v9 = vstv %s213_s8  ;;  %s215_s6 = sld [smem:[#allocation2 + %s214_s29]]  ;;  %s386_s20 = sshll.u32 %s623_s13, 3 }
  0x69   : > { %v226_v11 = vmul.f32 %v382_v2, %v225_v9  ;;  %v237_v16 = vstv %s836_s17  ;;  %s217_s26 = sld [smem:[#allocation2 + %s216_s1]]  ;;  %s269_s1 = sadd.s32 %s619_s12, %s386_s20 }
  0x6a   : > { %v224_v10 = vadd.f32 %v223_v6, %v221_v5  ;;  %v228_v12 = vstv %s219_s19  ;;  %v238_v23 = vmul.f32 %v382_v2, %v237_v16  ;;  %s190_s25 = scalar_lea.vmem [#allocation7], %s380_s0  ;;  %s387_s8 = sshll.u32 %s269_s1, 7 }
  0x6b   : > { %v243_v17 = vstv %s203_s24  ;;  %s272_s28 = sshll.u32 %s190_s25, 4  ;;  %s855_s18 = scalar_lea.hbm %s911_s2, %s387_s8  ;;  %s850_s28 = int_to_ptr.vmem [resolvable:$true] %s272_s28 }
  0x6c   : > { %v227_v15 = vadd.f32 %v226_v11, %v224_v10  ;;  %v245_v18 = vstv %s205_s5  ;;  %v244_v20 = vmul.f32 %v243_v17, %v191_v0  ;;  %v239_v27 = vadd.f32 %v238_v23, %v236_v22  ;;  %s258_s12 = scalar_lea.sflag [#allocation4], %s815_s30  ;;  %s533_s19 = scalar_lea.vmem %s850_s28, 256 }
  0x6d   : > { %v246_v21 = vmul.f32 %v381_v1, %v245_v18  ;;  %v248_v24 = vstv %s207_s7  ;;  %p534_p3 = scmp.ne.s32.totalorder %s850_s28, %s533_s19  ;;  %s642_s3 = smov [#allocation7]  }
  0x6e   : > { %v229_v19 = vadd.f32 %v228_v12, %v227_v15  ;;  %v249_v26 = vmul.f32 %v382_v2, %v248_v24  ;;  %v240_v29 = vstv %s215_s6  ;;  %s537_s4 = sshll.u32 %s642_s3, 4  ;;  %s538_s4 = int_to_ptr.vmem [resolvable:$false] %s537_s4 }
  0x6f   : > { %v247_v25 = vadd.f32 %v246_v21, %v244_v20  ;;  %v251_v30 = vstv %s217_s26  ;;  %v241_v31 = vadd.f32 %v240_v29, %v239_v27  ;;  %p535_p12 = pnand %p534_p3, %p934_p8  ;;  %s539_s24 = scalar_lea.vmem %s538_s4, 512 }
  0x70   : > { %488 = vrcp.f32 %v229_v19  ;;  %p540_p13 = scmp.lt.s32.totalorder %s850_s28, %s538_s4  ;;  %p541_p9 = scmp.lt.s32.totalorder %s539_s24, %s533_s19 }
  0x71   : > { %v250_v28 = vadd.f32 %v249_v26, %v247_v25  ;;  %p536_p6 = pneg %p535_p12 }
  0x72   : > { %p542_p1 = por %p541_p9, %p540_p13 }
  0x73   : > { %v252_v32 = vadd.f32 %v251_v30, %v250_v28 }
  0x74   : > { %p543_p0 = pnand %p542_p1, %p536_p6 }
  0x7a   : > { %v489_v33 = vpop.eup %488 }
  0x7b   : > { %v242_v34 = vmul.f32 %v489_v33, %v241_v31  ;;  %v253_v35 = vmul.f32 %v489_v33, %v252_v32 }
  0x7d   : > { %254 = vst [vmem:[%s190_s25] sm:$0xff] %v242_v34  ;;  %384 = vst [vmem:[%s190_s25 + $0x8] sm:$0xff] %v253_v35 }
  0x7e   : > { %546 = shalt.err (!%p543_p0)
}
  0x7f   : > { %s547_s5 = scalar_lea.hbm %s855_s18, 256  ;;  %s551_s7 = scalar_lea.hbm %s911_s2, 2048 }
  0x80   : > { %p548_p2 = scmp.ne.s32.totalorder %s855_s18, %s547_s5  ;;  %p552_p5 = scmp.lt.u32.totalorder %s855_s18, %s911_s2 }
  0x81   : > { %p553_p4 = scmp.lt.u32.totalorder %s551_s7, %s547_s5  ;;  %p555_p3 = scmp.lt.u32.totalorder %s547_s5, %s855_s18 }
  0x82   : > { %p549_p10 = pnand %p548_p2, %p934_p8 }
  0x83   : > { %p554_p7 = por %p553_p4, %p552_p5 }
  0x84   : > { %p550_p11 = pneg %p549_p10 }
  0x85   : > { %p556_p12 = por %p555_p3, %p554_p7 }
  0x87   : > { %p557_p6 = pnand %p556_p12, %p550_p11 }
  0x89   : > { %560 = shalt.err (!%p557_p6)
}
  0x8a   : > { %s643_s0 = smov 128   ;;  %s644_s20 = smov 512  }
  0x8b   : > { %s645_s1 = smov 8  }
  0x8c   : > { %399 = dma.vmem_to_hbm [thread:$0]  (%p934_p8), %s850_s28, 256, %s855_s18, %s258_s12, %s643_s0, %s644_s20, %s645_s1  }
  0x8d PF: > { %s935_s25 = sld [smem:[#allocation11_spill]]  ;;  %p416_p13 = scmp.ge.s32.totalorder %s635_s16, 2 }
  0x8e   : > { %s287_s8 = sand.u32 1, %s607_s9  }
  0x8f   : > { %s288_s13 = scalar_lea.sflag [#allocation4], %s287_s8 }
  0x93   : > { %p936_p9 = scmp.ne.s32.totalorder %s935_s25, 0 }
  0x95   : > { %p410_p1 = pnand %p416_p13, %p936_p9 }
  0x97   : > { %602 = dma.done.wait (!%p410_p1), %s288_s13, 256  }
  0x98   : > { %604 = vsyncadd (!%p410_p1), %s288_s13, 4294967040  ;;  %s19_s16 = sadd.s32 1, %s635_s16   ;;  %s937_s22 = sld [smem:[#allocation12_spill]] }
  0x99   : > { %p16_p0 = scmp.ge.s32.totalorder %s19_s16, 10   ;;  %s938_s9 = smov %s611_s10 }
  0x9a   : > { %s939_s10 = smov %s615_s11  ;;  %s940_s11 = smov %s778_s23 }
  0x9b   : > { %s941_s12 = smov %s627_s14  ;;  %s942_s13 = smov %s631_s15 }
  0x9c   : > { %s944_s15 = smov %s950_s27  ;;  %18 = sbr.rel (!%p16_p0) target bundleno = 11 (0xb), region = 81 }
  0x9e   : > { %s943_s14 = smov %s937_s22 }
  0xa3   :  { %293 = vsyncpa [#allocation3], 1 }
  0xa4   :  { %295 = vsyncpa [#allocation3 + $0x1], 1 }
  0xa5   :  { %296 = vsyncpa [#allocation4], 1 }
  0xa6   :  { %298 = vsyncpa [#allocation4 + $0x1], 1 }
  0xa7   :  { %299 = vsyncpa [#allocation5], 1 }
  0xa8   :  { %301 = vsyncpa [#allocation5 + $0x1], 1 }

</bundles_post_ra>
